<compile_context>
chip_gen: v5e
topology: v5e:2x2
jax: 0.10.0
libtpu: 0.0.40
codegen_flags: <defaults>
</compile_context>

<pallas_src>
import functools

import jax
import jax.numpy as jnp
from jax.experimental import pallas as pl
from jax.experimental.pallas import tpu as pltpu

_LANE = 128
_SUBLANE = 8


def _round_up(x, m):
    return (x + m - 1) // m * m


# ---------------------------------------------------------------------------
# Kernel: one batch tile -> fc1 + ReLU + fc2(+residual) + ReLU + fc3, in VMEM.
# ---------------------------------------------------------------------------
def _fused_mlp_kernel(x_ref, w1_ref, b1_ref, w2_ref, b2_ref, w3_ref, b3_ref,
                      o_ref, *, residual):
    # fc1: f32 x f32 on the MXU (K = state_size is tiny) -> full input
    # precision, no separate XLA cast pass over x.
    h1 = jnp.dot(x_ref[...], w1_ref[...], preferred_element_type=jnp.float32)
    h1 = jnp.maximum(h1 + b1_ref[...], 0.0)
    # fc2 / ConcatLinear(t=0): bf16 weights, f32 accumulation.  For the ODE
    # branch the Euler step size T is already folded into W2/b2.
    f = jnp.dot(h1.astype(w2_ref.dtype), w2_ref[...],
                preferred_element_type=jnp.float32) + b2_ref[...]
    h2 = jnp.maximum(h1 + f, 0.0) if residual else jnp.maximum(f, 0.0)
    # fc3: only the true `action` columns are computed and written back.
    out = jnp.dot(h2.astype(w3_ref.dtype), w3_ref[...],
                  preferred_element_type=jnp.float32) + b3_ref[...]
    o_ref[...] = out.astype(o_ref.dtype)


# ---------------------------------------------------------------------------
# One-time parameter preprocessing (hoisted out of the hot path).
# ---------------------------------------------------------------------------
def prepare_mlp_params(w1, b1, fc2_params, w3, b3, integration_right_limit,
                       compute_dtype=jnp.bfloat16):
    """w1: [64, state], b1: [64]; fc2_params: (Wc [64,65], bc [64]) for the ODE
    branch or (W2 [64,64], b2 [64]) for the plain-Linear branch; w3: [A,64]."""
    state_size = w1.shape[1]
    hidden = w1.shape[0]
    action = w3.shape[0]
    hp = _round_up(hidden, _LANE)
    use_ode = (float(integration_right_limit) != -1.0)

    def pad2(a, shape):
        out = jnp.zeros(shape, jnp.float32)
        return out.at[:a.shape[0], :a.shape[1]].set(a.astype(jnp.float32))

    def padb(b, n):
        return jnp.zeros((1, n), jnp.float32).at[0, :b.shape[0]].set(
            b.astype(jnp.float32))

    # fc1 stays f32 (few KiB) so the state input keeps full precision.
    w1x = pad2(w1.T, (state_size, hp))
    b1p = padb(b1, hp)

    if use_ode:
        wc, bc = fc2_params
        T = float(integration_right_limit)      # Euler dt = T - 0
        t0 = 0.0                                # f is evaluated at t = 0
        b2_eff = T * (t0 * wc[:, 0] + bc)       # fold t-column and dt into bias
        w2_eff = T * wc[:, 1:]                  # fold dt into the weight
        w2x = pad2(w2_eff.T, (hp, hp)).astype(compute_dtype)
        b2p = padb(b2_eff, hp)
    else:
        w2, b2 = fc2_params
        w2x = pad2(w2.T, (hp, hp)).astype(compute_dtype)
        b2p = padb(b2, hp)

    # fc3: pad only the contraction (hidden) dim; output columns stay at the
    # true action count -> the kernel never writes a lane-padded output slab.
    w3x = pad2(w3.T, (hp, action)).astype(compute_dtype)
    b3p = padb(b3, action)

    return dict(w1=w1x, b1=b1p, w2=w2x, b2=b2p, w3=w3x, b3=b3p,
                state_size=state_size, action=action, hp=hp, use_ode=use_ode)


# ---------------------------------------------------------------------------
# Forward: batch-tiled grid, resident weights, unpadded output.
# ---------------------------------------------------------------------------
def _pick_batch_tile(B, block_b):
    if B <= 64:
        # Single block; block == full batch dim is always a legal block shape.
        return B
    # >= 2 grid steps so v7x's second TensorCore gets work; large tiles for
    # big batches (per-step overhead ~0.35 us) capped at block_b.
    return min(block_b, _round_up((B + 1) // 2, _SUBLANE))


def mlp_forward(prep, x, *, block_b=1024):
    B, ds = x.shape
    assert ds == prep["state_size"]
    hp, act = prep["hp"], prep["action"]

    x = x.astype(jnp.float32)            # no-op for f32 inputs
    tm = _pick_batch_tile(B, block_b)
    grid = (pl.cdiv(B, tm),)             # ragged last tile handled by Pallas

    kernel = functools.partial(_fused_mlp_kernel, residual=prep["use_ode"])

    out = pl.pallas_call(
        kernel,
        out_shape=jax.ShapeDtypeStruct((B, act), jnp.float32),
        grid=grid,
        in_specs=[
            pl.BlockSpec((tm, ds), lambda i: (i, 0)),    # x   (batch-tiled, f32)
            pl.BlockSpec((ds, hp), lambda i: (0, 0)),    # W1  (resident, f32)
            pl.BlockSpec((1, hp), lambda i: (0, 0)),     # b1
            pl.BlockSpec((hp, hp), lambda i: (0, 0)),    # W2  (bf16; T folded in)
            pl.BlockSpec((1, hp), lambda i: (0, 0)),     # b2
            pl.BlockSpec((hp, act), lambda i: (0, 0)),   # W3  (bf16, true N)
            pl.BlockSpec((1, act), lambda i: (0, 0)),    # b3
        ],
        out_specs=pl.BlockSpec((tm, act), lambda i: (i, 0)),
        compiler_params=pltpu.CompilerParams(
            dimension_semantics=("parallel",)),          # megacore shard on v7x
    )(x, prep["w1"], prep["b1"], prep["w2"], prep["b2"], prep["w3"], prep["b3"])
    return out


# ---------------------------------------------------------------------------
# Demo / correctness check.
# ---------------------------------------------------------------------------
if __name__ == "__main__":
    key = jax.random.PRNGKey(0)
    state_size, action_size, hidden = 8, 4, 64

    def linear_init(kw, kb, out_dim, in_dim):
        bound = 1.0 / jnp.sqrt(jnp.float32(in_dim))
        w = jax.random.uniform(kw, (out_dim, in_dim), minval=-bound, maxval=bound,
                               dtype=jnp.float32)
        b = jax.random.uniform(kb, (out_dim,), minval=-bound, maxval=bound,
                               dtype=jnp.float32)
        return w, b

    ks = jax.random.split(key, 12)
    w1, b1 = linear_init(ks[0], ks[1], hidden, state_size)
    wc, bc = linear_init(ks[2], ks[3], hidden, hidden + 1)   # ConcatLinear(64, 64)
    w2, b2 = linear_init(ks[4], ks[5], hidden, hidden)       # plain fc2 branch
    w3, b3 = linear_init(ks[6], ks[7], action_size, hidden)

    def ref_ode(x, T):
        h1 = jax.nn.relu(x @ w1.T + b1)
        tt = jnp.zeros_like(h1[:, :1])                       # t = 0
        f0 = jnp.concatenate([tt, h1], axis=1) @ wc.T + bc
        h2 = jax.nn.relu(h1 + T * f0)                        # one Euler step, dt=T
        return h2 @ w3.T + b3

    def ref_linear(x):
        g1 = jax.nn.relu(x @ w1.T + b1)
        g2 = jax.nn.relu(g1 @ w2.T + b2)
        return g2 @ w3.T + b3

    ok = True

    # ---- Branch 1: INTEGRATION_RIGHT_LIMIT = 1.0 (MLP_ODE / ConcatLinear) ----
    T = 1.0
    prep_ode = prepare_mlp_params(w1, b1, (wc, bc), w3, b3, T)

    B = 32
    x = jax.random.normal(ks[8], (B, state_size), dtype=jnp.float32)
    y = jax.block_until_ready(mlp_forward(prep_ode, x))
    ok &= (y.shape == (B, action_size))
    ok &= bool(jnp.allclose(y, ref_ode(x, T), atol=3e-2, rtol=3e-2))

    # ---- Branch 2: INTEGRATION_RIGHT_LIMIT = -1.0 (plain Linear fc2) ----
    B2 = 10                                        # block == full batch dim
    x2 = jax.random.normal(ks[9], (B2, state_size), dtype=jnp.float32)
    prep_lin = prepare_mlp_params(w1, b1, (w2, b2), w3, b3, -1.0)
    y2 = jax.block_until_ready(mlp_forward(prep_lin, x2))
    ok &= (y2.shape == (B2, action_size))
    ok &= bool(jnp.allclose(y2, ref_linear(x2), atol=3e-2, rtol=3e-2))

    # ---- Branch 1 again, multi-step grid with a ragged last tile ----
    B3 = 100                                       # tm=56, grid=2, last tile ragged
    x3 = jax.random.normal(ks[10], (B3, state_size), dtype=jnp.float32)
    y3 = jax.block_until_ready(mlp_forward(prep_ode, x3))
    ok &= (y3.shape == (B3, action_size))
    ok &= bool(jnp.allclose(y3, ref_ode(x3, T), atol=3e-2, rtol=3e-2))

    assert ok, "mismatch vs reference"
    print("KERNEL_OK")
</pallas_src>

<mosaic_0001>
module attributes {stable_mosaic.version = 11 : i64} {
  func.func @_fused_mlp_kernel(%arg0: i32, %arg1: memref<32x8xf32, #tpu.memory_space<vmem>>, %arg2: memref<8x128xf32, #tpu.memory_space<vmem>>, %arg3: memref<1x128xf32, #tpu.memory_space<vmem>>, %arg4: memref<128x128xbf16, #tpu.memory_space<vmem>>, %arg5: memref<1x128xf32, #tpu.memory_space<vmem>>, %arg6: memref<128x4xbf16, #tpu.memory_space<vmem>>, %arg7: memref<1x4xf32, #tpu.memory_space<vmem>>, %arg8: memref<32x4xf32, #tpu.memory_space<vmem>>) attributes {dimension_semantics = [#tpu.dimension_semantics<parallel>], iteration_bounds = array<i64: 1>, scalar_prefetch = 0 : i64, scratch_operands = 0 : i64, tpu.core_type = #tpu.core_type<tc>, window_params = [{transform_indices = @transform_0, window_bounds = array<i64: 32, 8>}, {pipeline_mode = #tpu.pipeline_mode<synchronous>, transform_indices = @transform_1, window_bounds = array<i64: 8, 128>}, {pipeline_mode = #tpu.pipeline_mode<synchronous>, transform_indices = @transform_2, window_bounds = array<i64: 1, 128>}, {pipeline_mode = #tpu.pipeline_mode<synchronous>, transform_indices = @transform_3, window_bounds = array<i64: 128, 128>}, {pipeline_mode = #tpu.pipeline_mode<synchronous>, transform_indices = @transform_4, window_bounds = array<i64: 1, 128>}, {pipeline_mode = #tpu.pipeline_mode<synchronous>, transform_indices = @transform_5, window_bounds = array<i64: 128, 4>}, {pipeline_mode = #tpu.pipeline_mode<synchronous>, transform_indices = @transform_6, window_bounds = array<i64: 1, 4>}, {transform_indices = @transform_7, window_bounds = array<i64: 32, 4>}]} {
    %c0 = arith.constant 0 : index
    %c0_0 = arith.constant 0 : index
    %0 = vector.load %arg1[%c0, %c0_0] : memref<32x8xf32, #tpu.memory_space<vmem>>, vector<32x8xf32>
    %c0_1 = arith.constant 0 : index
    %c0_2 = arith.constant 0 : index
    %1 = vector.load %arg2[%c0_1, %c0_2] : memref<8x128xf32, #tpu.memory_space<vmem>>, vector<8x128xf32>
    %cst = arith.constant dense<0.000000e+00> : vector<32x128xf32>
    %2 = tpu.matmul %0, %1, %cst {dimension_numbers = #tpu.dot_dimension_numbers<[1], [0], [0], [1], [0, 0, 1, 1], [], []>} : vector<32x8xf32>, vector<8x128xf32>, vector<32x128xf32> -> vector<32x128xf32>
    %c0_3 = arith.constant 0 : index
    %c0_4 = arith.constant 0 : index
    %3 = vector.load %arg3[%c0_3, %c0_4] : memref<1x128xf32, #tpu.memory_space<vmem>>, vector<1x128xf32>
    %4 = vector.broadcast %3 : vector<1x128xf32> to vector<32x128xf32>
    %5 = arith.addf %2, %4 : vector<32x128xf32>
    %cst_5 = arith.constant 0.000000e+00 : f32
    %6 = vector.broadcast %cst_5 : f32 to vector<32x128xf32>
    %7 = arith.maximumf %5, %6 : vector<32x128xf32>
    %8 = arith.truncf %7 : vector<32x128xf32> to vector<32x128xbf16>
    %c0_6 = arith.constant 0 : index
    %c0_7 = arith.constant 0 : index
    %9 = vector.load %arg4[%c0_6, %c0_7] : memref<128x128xbf16, #tpu.memory_space<vmem>>, vector<128x128xbf16>
    %cst_8 = arith.constant dense<0.000000e+00> : vector<32x128xf32>
    %10 = tpu.matmul %8, %9, %cst_8 {dimension_numbers = #tpu.dot_dimension_numbers<[1], [0], [0], [1], [0, 0, 1, 1], [], []>} : vector<32x128xbf16>, vector<128x128xbf16>, vector<32x128xf32> -> vector<32x128xf32>
    %c0_9 = arith.constant 0 : index
    %c0_10 = arith.constant 0 : index
    %11 = vector.load %arg5[%c0_9, %c0_10] : memref<1x128xf32, #tpu.memory_space<vmem>>, vector<1x128xf32>
    %12 = vector.broadcast %11 : vector<1x128xf32> to vector<32x128xf32>
    %13 = arith.addf %10, %12 : vector<32x128xf32>
    %14 = arith.addf %7, %13 : vector<32x128xf32>
    %cst_11 = arith.constant 0.000000e+00 : f32
    %15 = vector.broadcast %cst_11 : f32 to vector<32x128xf32>
    %16 = arith.maximumf %14, %15 : vector<32x128xf32>
    %17 = arith.truncf %16 : vector<32x128xf32> to vector<32x128xbf16>
    %c0_12 = arith.constant 0 : index
    %c0_13 = arith.constant 0 : index
    %18 = vector.load %arg6[%c0_12, %c0_13] : memref<128x4xbf16, #tpu.memory_space<vmem>>, vector<128x4xbf16>
    %cst_14 = arith.constant dense<0.000000e+00> : vector<32x4xf32>
    %19 = tpu.matmul %17, %18, %cst_14 {dimension_numbers = #tpu.dot_dimension_numbers<[1], [0], [0], [1], [0, 0, 1, 1], [], []>} : vector<32x128xbf16>, vector<128x4xbf16>, vector<32x4xf32> -> vector<32x4xf32>
    %c0_15 = arith.constant 0 : index
    %c0_16 = arith.constant 0 : index
    %20 = vector.load %arg7[%c0_15, %c0_16] : memref<1x4xf32, #tpu.memory_space<vmem>>, vector<1x4xf32>
    %21 = vector.broadcast %20 : vector<1x4xf32> to vector<32x4xf32>
    %22 = arith.addf %19, %21 : vector<32x4xf32>
    %c0_17 = arith.constant 0 : index
    %c0_18 = arith.constant 0 : index
    %23 = vector.load %arg8[%c0_17, %c0_18] : memref<32x4xf32, #tpu.memory_space<vmem>>, vector<32x4xf32>
    tpu.vector_store %arg8[%c0_17, %c0_18], %22 {strides = array<i32>} : memref<32x4xf32, #tpu.memory_space<vmem>>, vector<32x4xf32>,
    return
  }
  func.func @transform_0(%arg0: i32) -> (i32, i32) {
    %c0_i32 = arith.constant 0 : i32
    %c0_i32_0 = arith.constant 0 : i32
    return %arg0, %c0_i32 : i32, i32
  }
  func.func @transform_1(%arg0: i32) -> (i32, i32) {
    %c0_i32 = arith.constant 0 : i32
    %c0_i32_0 = arith.constant 0 : i32
    %c0_i32_1 = arith.constant 0 : i32
    return %c0_i32, %c0_i32_0 : i32, i32
  }
  func.func @transform_2(%arg0: i32) -> (i32, i32) {
    %c0_i32 = arith.constant 0 : i32
    %c0_i32_0 = arith.constant 0 : i32
    %c0_i32_1 = arith.constant 0 : i32
    return %c0_i32, %c0_i32_0 : i32, i32
  }
  func.func @transform_3(%arg0: i32) -> (i32, i32) {
    %c0_i32 = arith.constant 0 : i32
    %c0_i32_0 = arith.constant 0 : i32
    %c0_i32_1 = arith.constant 0 : i32
    return %c0_i32, %c0_i32_0 : i32, i32
  }
  func.func @transform_4(%arg0: i32) -> (i32, i32) {
    %c0_i32 = arith.constant 0 : i32
    %c0_i32_0 = arith.constant 0 : i32
    %c0_i32_1 = arith.constant 0 : i32
    return %c0_i32, %c0_i32_0 : i32, i32
  }
  func.func @transform_5(%arg0: i32) -> (i32, i32) {
    %c0_i32 = arith.constant 0 : i32
    %c0_i32_0 = arith.constant 0 : i32
    %c0_i32_1 = arith.constant 0 : i32
    return %c0_i32, %c0_i32_0 : i32, i32
  }
  func.func @transform_6(%arg0: i32) -> (i32, i32) {
    %c0_i32 = arith.constant 0 : i32
    %c0_i32_0 = arith.constant 0 : i32
    %c0_i32_1 = arith.constant 0 : i32
    return %c0_i32, %c0_i32_0 : i32, i32
  }
  func.func @transform_7(%arg0: i32) -> (i32, i32) {
    %c0_i32 = arith.constant 0 : i32
    %c0_i32_0 = arith.constant 0 : i32
    return %arg0, %c0_i32 : i32, i32
  }
}

</mosaic_0001>

<bundles_post_ra>
// kernel: tpu_custom_call.1
= control target key start
LH: loop header
LB: loop body
LE: loop exit
PB: predicated region body
PF: predicated region fallthrough
CT: control target
= control target key end

     0   :  { %vm35_vm0 = vcmask 64512   ;;  %vm267_vm1 = vcmask 31744   ;;  %s507_s1 = inlined_call_operand.vmem [shape: f32[8,128], index: 1, kind: input, shape index: {}]   ;;  %s508_s0 = inlined_call_operand.vmem [shape: f32[32,8], index: 0, kind: input, shape index: {}]   ;;  %s509_s3 = inlined_call_operand.vmem [shape: bf16[128,128], index: 3, kind: input, shape index: {}]   ;;  %s510_s2 = inlined_call_operand.vmem [shape: f32[1,128], index: 2, kind: input, shape index: {}]   ;;  %s511_s4 = inlined_call_operand.vmem [shape: f32[1,128], index: 4, kind: input, shape index: {}]   ;;  %s512_s5 = inlined_call_operand.vmem [shape: bf16[128,4], index: 5, kind: input, shape index: {}]   ;;  %s513_s6 = inlined_call_operand.vmem [shape: f32[1,4], index: 6, kind: input, shape index: {}]   ;;  %s514_s7 = inlined_call_operand.vmem [shape: f32[32,4], index: 7, kind: output, shape index: {}]  }
   0x1   :  { %v30_v0 = vld [vmem:[%s507_s1] sm:$0xff]  ;;  %v351_v2 = vld [vmem:[%s509_s3 + $0x38] sm:$0xff]  ;;  %v350_v3 = vld [vmem:[%s509_s3 + $0x30] sm:$0xff] }
   0x2   :  { %v26_v1 = vld [vmem:[%s508_s0] sm:$0xff]  ;;  %63 = vmatpush.msra.mxu0 %v30_v0  ;;  %151 = vmatpush.bf16.msra.mxu1 %v351_v2  ;;  %v27_v4 = vld [vmem:[%s508_s0 + $0x8] sm:$0xff]  ;;  %v28_v7 = vld [vmem:[%s508_s0 + $0x10] sm:$0xff] }
   0x3   :  { %276 = vmatmul.msk.f32.vlgmr.msra.gmra.mxu0 %vm35_vm0, %v26_v1  ;;  %360 = vmatpush.bf16.msra.mxu3 %v351_v2  ;;  %v349_v5 = vld [vmem:[%s509_s3 + $0x28] sm:$0xff]  ;;  %v348_v6 = vld [vmem:[%s509_s3 + $0x20] sm:$0xff]  ;;  %v29_v8 = vld [vmem:[%s508_s0 + $0x18] sm:$0xff] }
   0x4   :  { %v347_v9 = vld [vmem:[%s509_s3 + $0x18] sm:$0xff]  ;;  %v346_v10 = vld [vmem:[%s509_s3 + $0x10] sm:$0xff]  ;;  %v345_v11 = vld [vmem:[%s509_s3 + $0x8] sm:$0xff] }
   0x5   :  { %v344_v12 = vld [vmem:[%s509_s3] sm:$0xff]  ;;  %v359_v13 = vld [vmem:[%s512_s5 + $0x38] sm:$0xff]  ;;  %v358_v15 = vld [vmem:[%s512_s5 + $0x30] sm:$0xff] }
   0x6   :  { %152 = vmatpush.bf16.msra.mxu1 %v350_v3  ;;  %248 = vmatpush.bf16.msrb.mxu0 %v359_v13  ;;  %v376_v16 = vld [vmem:[%s510_s2] ss:$0 sm:$0xff]  ;;  %v357_v17 = vld [vmem:[%s512_s5 + $0x28] sm:$0xff]  ;;  %v355_v32 = vld [vmem:[%s512_s5 + $0x18] sm:$0xff] }
   0x7   :  { %361 = vmatpush.bf16.msra.mxu3 %v350_v3  ;;  %368 = vmatpush.bf16.msra.mxu2 %v359_v13  ;;  %v356_v21 = vld [vmem:[%s512_s5 + $0x20] sm:$0xff]  ;;  %v354_v33 = vld [vmem:[%s512_s5 + $0x10] sm:$0xff]  ;;  %v353_v34 = vld [vmem:[%s512_s5 + $0x8] sm:$0xff] }
   0x8   :  { %v352_v35 = vld [vmem:[%s512_s5] sm:$0xff] }
   0x9   :  { %v377_v37 = vld [vmem:[%s511_s4] ss:$0 sm:$0xff] }
   0xa   :  { %153 = vmatpush.bf16.msra.mxu1 %v349_v5  ;;  %249 = vmatpush.bf16.msrb.mxu0 %v358_v15  ;;  %v378_v55 = vld [vmem:[%s513_s6] ss:$0 sm:$0xff] }
   0xb   :  { %277 = vmatmul.msk.f32.gmra.mxu0 %vm35_vm0, %v27_v4  ;;  %362 = vmatpush.bf16.msra.mxu3 %v349_v5 }
   0xc   :  { %369 = vmatpush.bf16.msra.mxu2 %v358_v15 }
   0xe   :  { %154 = vmatpush.bf16.msra.mxu1 %v348_v6  ;;  %250 = vmatpush.bf16.msrb.mxu0 %v357_v17 }
   0xf   :  { %363 = vmatpush.bf16.msra.mxu3 %v348_v6 }
  0x10   :  { %370 = vmatpush.bf16.msra.mxu2 %v357_v17 }
  0x12   :  { %155 = vmatpush.bf16.msra.mxu1 %v347_v9  ;;  %251 = vmatpush.bf16.msrb.mxu0 %v356_v21 }
  0x13   :  { %278 = vmatmul.msk.f32.gmra.mxu0 %vm35_vm0, %v28_v7  ;;  %364 = vmatpush.bf16.msra.mxu3 %v347_v9 }
  0x14   :  { %371 = vmatpush.bf16.msra.mxu2 %v356_v21 }
  0x16   :  { %156 = vmatpush.bf16.msra.mxu1 %v346_v10  ;;  %252 = vmatpush.bf16.msrb.mxu0 %v355_v32 }
  0x17   :  { %365 = vmatpush.bf16.msra.mxu3 %v346_v10 }
  0x18   :  { %372 = vmatpush.bf16.msra.mxu2 %v355_v32 }
  0x1a   :  { %157 = vmatpush.bf16.msra.mxu1 %v345_v11  ;;  %253 = vmatpush.bf16.msrb.mxu0 %v354_v33 }
  0x1b   :  { %279 = vmatmul.msk.f32.gmra.mxu0 %vm35_vm0, %v29_v8  ;;  %366 = vmatpush.bf16.msra.mxu3 %v345_v11 }
  0x1c   :  { %373 = vmatpush.bf16.msra.mxu2 %v354_v33 }
  0x1e   :  { %158 = vmatpush.bf16.msra.mxu1 %v344_v12  ;;  %254 = vmatpush.bf16.msrb.mxu0 %v353_v34 }
  0x1f   :  { %367 = vmatpush.bf16.msra.mxu3 %v344_v12 }
  0x20   :  { %374 = vmatpush.bf16.msra.mxu2 %v353_v34 }
  0x22   :  { %255 = vmatpush.bf16.msrb.mxu0 %v352_v35 }
  0x24   :  { %375 = vmatpush.bf16.msra.mxu2 %v352_v35 }
  0x80   :  { %v65_v14 = vpop.f32.mrf.mxu0 }
  0x81   :  { %v66_v18 = vadd.f32 %v376_v16, %v65_v14 }
  0x83   :  { %v77_v22 = vmax.f32 %v66_v18, 0.0 }
  0x88   :  { %v68_v19 = vpop.f32.mrf.mxu0 }
  0x89   :  { %v69_v20 = vadd.f32 %v376_v16, %v68_v19 }
  0x8b   :  { %v78_v23 = vmax.f32 %v69_v20, 0.0 }
  0x8d   :  { %v81_v24 = vpack.c.bf16 %v78_v23, %v77_v22 }
  0x8f   :  { %159 = vmatmul.bf16.vlgmr.msra.gmra.mxu1 %v81_v24 }
  0x90   :  { %v71_v25 = vpop.f32.mrf.mxu0 }
  0x91   :  { %v72_v26 = vadd.f32 %v376_v16, %v71_v25 }
  0x93   :  { %v79_v29 = vmax.f32 %v72_v26, 0.0 }
  0x98   :  { %v74_v27 = vpop.f32.mrf.mxu0 }
  0x99   :  { %v75_v28 = vadd.f32 %v376_v16, %v74_v27 }
  0x9b   :  { %v80_v30 = vmax.f32 %v75_v28, 0.0 }
  0x9d   :  { %v82_v31 = vpack.c.bf16 %v80_v30, %v79_v29 }
  0x9f   :  { %164 = vmatmul.bf16.vlgmr.msra.gmra.mxu3 %v82_v31 }
 0x10c   :  { %v160_v36 = vpop.f32.mrf.mxu1 }
 0x10d   :  { %v161_v38 = vadd.f32 %v377_v37, %v160_v36 }
 0x10f   :  { %v170_v40 = vadd.f32 %v161_v38, %v77_v22 }
 0x111   :  { %v174_v43 = vmax.f32 %v170_v40, 0.0 }
 0x114   :  { %v162_v39 = vpop.f32.mrf.mxu1 }
 0x115   :  { %v163_v41 = vadd.f32 %v377_v37, %v162_v39 }
 0x117   :  { %v171_v42 = vadd.f32 %v163_v41, %v78_v23 }
 0x119   :  { %v175_v44 = vmax.f32 %v171_v42, 0.0 }
 0x11b   :  { %v178_v45 = vpack.c.bf16 %v175_v44, %v174_v43 }
 0x11d   :  { %256 = vmatmul.bf16.vlgmr.msrb.gmra.mxu0 %v178_v45 }
 0x122   :  { %v165_v46 = vpop.f32.mrf.mxu3 }
 0x123   :  { %v166_v47 = vadd.f32 %v377_v37, %v165_v46 }
 0x125   :  { %v172_v49 = vadd.f32 %v166_v47, %v79_v29 }
 0x127   :  { %v176_v52 = vmax.f32 %v172_v49, 0.0 }
 0x12a   :  { %v167_v48 = vpop.f32.mrf.mxu3 }
 0x12b   :  { %v168_v50 = vadd.f32 %v377_v37, %v167_v48 }
 0x12d   :  { %v173_v51 = vadd.f32 %v168_v50, %v80_v30 }
 0x12f   :  { %v177_v53 = vmax.f32 %v173_v51, 0.0 }
 0x131   :  { %v179_v54 = vpack.c.bf16 %v177_v53, %v176_v52 }
 0x133   :  { %261 = vmatmul.bf16.vlgmr.msra.gmra.mxu2 %v179_v54 }
 0x19a   :  { %v257_v56 = vpop.f32.mrf.mxu0 }
 0x19b   :  { %v258_v57 = vadd.f32 %v378_v55, %v257_v56 }
 0x19d   :  { %268 = vst.msk [vmem:[%s514_s7] sm:$0xff] %vm267_vm1, %v258_v57 }
 0x1a2   :  { %v259_v58 = vpop.f32.mrf.mxu0 }
 0x1a3   :  { %v260_v59 = vadd.f32 %v378_v55, %v259_v58 }
 0x1a5   :  { %269 = vst.msk [vmem:[%s514_s7 + $0x8] sm:$0xff] %vm267_vm1, %v260_v59 }
 0x1b6   :  { %v262_v60 = vpop.f32.mrf.mxu2 }
 0x1b7   :  { %v263_v61 = vadd.f32 %v378_v55, %v262_v60 }
 0x1b9   :  { %270 = vst.msk [vmem:[%s514_s7 + $0x10] sm:$0xff] %vm267_vm1, %v263_v61 }
 0x1be   :  { %v264_v62 = vpop.f32.mrf.mxu2 }
 0x1bf   :  { %v265_v63 = vadd.f32 %v378_v55, %v264_v62 }
 0x1c1   :  { %271 = vst.msk [vmem:[%s514_s7 + $0x18] sm:$0xff] %vm267_vm1, %v265_v63 }

</bundles_post_ra>
